<compile_context>
chip_gen: v7x
topology: tpu7x:2x2x1
jax: 0.10.0
libtpu: 0.0.40
codegen_flags: <defaults>
</compile_context>

<pallas_src>
import functools
import math

import jax
import jax.numpy as jnp
from jax.experimental import pallas as pl
from jax.experimental.pallas import tpu as pltpu


# --------------------------------------------------------------------------- #
# Kernels
# --------------------------------------------------------------------------- #
def _silu_f32(out):
    # exp goes to the EUP slot; the epilogue is essentially free next to DMA/MXU.
    return out * jax.nn.sigmoid(out)


def _fullk_kernel(x_ref, a_ref, o_ref, *, compute_dtype):
    # x_ref: (tm, K) row tile of x;  a_ref: (K, R) resident cola_a;  o_ref: (tm, R)
    x = x_ref[...]
    a = a_ref[...]
    if compute_dtype is not None:
        x = x.astype(compute_dtype)
        a = a.astype(compute_dtype)
    out = jnp.dot(x, a, preferred_element_type=jnp.float32)
    o_ref[...] = _silu_f32(out).astype(o_ref.dtype)


def _ktiled_kernel(x_ref, a_ref, o_ref, acc_ref, *, tk, resident_a, compute_dtype):
    # x_ref:   (tm, tk)          row/K tile of x
    # a_ref:   (K, R) resident   OR (tk, R) streamed K-slice of cola_a
    # o_ref:   (tm, R)           output tile (resident across the K grid axis)
    # acc_ref: (tm, R)           f32 accumulator scratch
    kk = pl.program_id(1)

    @pl.when(kk == 0)
    def _init():
        acc_ref[...] = jnp.zeros_like(acc_ref)

    x = x_ref[...]
    if resident_a:
        start = pl.multiple_of(kk * tk, tk)
        a = a_ref[pl.ds(start, tk), :]
    else:
        a = a_ref[...]
    if compute_dtype is not None:
        x = x.astype(compute_dtype)
        a = a.astype(compute_dtype)

    acc_ref[...] += jnp.dot(x, a, preferred_element_type=jnp.float32)

    @pl.when(kk == pl.num_programs(1) - 1)
    def _finalize():
        o_ref[...] = _silu_f32(acc_ref[...]).astype(o_ref.dtype)


# --------------------------------------------------------------------------- #
# Tiling heuristics
# --------------------------------------------------------------------------- #
def _round_up(x, m):
    return ((x + m - 1) // m) * m


def _tpu_vmem_info():
    """(vmem budget for tiles, cap for vmem_limit_bytes, likely 2 TCs/chip)."""
    cap = 64 << 20  # conservative default (v7x per-core VMEM)
    try:
        cap = int(pltpu.get_tpu_info().vmem_capacity_bytes)
    except Exception:  # older jax / interpret mode — keep conservative default
        pass
    if cap <= (64 << 20):
        # v7x-class: 64 MiB per TensorCore, 2 TCs share the parallel grid axis.
        return 38 << 20, 52 << 20, True
    # v5e/v6e-class: 128 MiB physical VMEM — allow much larger row tiles.
    return 88 << 20, 100 << 20, False


def _plan(m, k, rank, x_bytes, a_bytes, out_bytes,
          tm_req, tk_req, budget, two_cores, a_resident_req):
    """Returns (tm, tk, resident_a, vmem_footprint_bytes)."""
    row_mult = max(8, 32 // x_bytes)       # sublane multiple for the x dtype
    min_tk = 256 if x_bytes <= 2 else 128  # keep per-row DMA chunks >= 512 B

    def footprint(tm_, tk_, resident):
        a_buf = (2 * k * rank * a_bytes) if (resident or tk_ >= k) \
            else (2 * tk_ * rank * a_bytes)
        acc = tm_ * rank * 4 if tk_ < k else 0
        return (2 * tm_ * tk_ * x_bytes        # double-buffered x tiles
                + a_buf                        # cola_a (resident or streamed)
                + 2 * tm_ * rank * out_bytes   # double-buffered output tiles
                + acc)                         # f32 accumulator scratch

    def k_divisors():
        out = []
        t = min_tk
        while t < k:
            if k % t == 0:
                out.append(t)
            t += min_tk
        return sorted(out, reverse=True)

    # ---- row-tile candidates ------------------------------------------------
    if tm_req is not None:
        tm_candidates = [max(row_mult, _round_up(tm_req, row_mult))]
    else:
        tm0 = _round_up(min(1024, _round_up(m, row_mult)), row_mult)
        # Megacore (v7x): make sure both TensorCores get a row block.
        if two_cores and m > row_mult and pl.cdiv(m, tm0) < 2:
            tm0 = max(row_mult, _round_up(pl.cdiv(m, 2), row_mult))
        tm_candidates = []
        t = tm0
        while True:
            tm_candidates.append(t)
            if t <= row_mult:
                break
            t = max(row_mult, _round_up(t // 2, row_mult))

    # ---- user-supplied reduction tile ----------------------------------------
    if tk_req is not None:
        tm = tm_candidates[0]
        if tk_req >= k:
            return tm, k, True, footprint(tm, k, True)
        if k % tk_req != 0 or tk_req % 128 != 0:
            raise ValueError(
                f"tk={tk_req} must divide in_features={k} and be a multiple of "
                "128 (the ragged K tail is not masked).")
        if a_resident_req is None:
            resident = footprint(tm, tk_req, True) <= budget
        else:
            resident = bool(a_resident_req)
        return tm, tk_req, resident, footprint(tm, tk_req, resident)

    # ---- automatic reduction tile --------------------------------------------
    for tm in tm_candidates:
        # (a) full-K row tile: common case, no accumulator / scratch.
        if footprint(tm, k, True) <= budget:
            return tm, k, True, footprint(tm, k, True)
        # (b) K-tiled with cola_a fully resident in VMEM (fetched once).
        if a_resident_req is not False:
            for tk in k_divisors():
                if footprint(tm, tk, True) <= budget:
                    return tm, tk, True, footprint(tm, tk, True)
        # (c) K-tiled with cola_a streamed per (i, kk) block (huge K*rank only).
        if a_resident_req is not True:
            for tk in k_divisors():
                if footprint(tm, tk, False) <= budget:
                    return tm, tk, False, footprint(tm, tk, False)

    raise ValueError(
        "cola_m_down_proj: no tiling fits VMEM "
        f"(M={m}, K={k}, rank={rank}); pad in_features to a multiple of "
        f"{min_tk} or pass explicit tm/tk.")


# --------------------------------------------------------------------------- #
# Wrapper
# --------------------------------------------------------------------------- #
@functools.partial(jax.jit,
                   static_argnames=("tm", "tk", "compute_dtype", "a_resident"))
def cola_m_down_proj(x, cola_a, *, tm=None, tk=None, compute_dtype=None,
                     a_resident=None):
    """Pallas implementation of ColaMDownProjLayer.forward with lr_act=silu.

    x:             (..., in_features)
    cola_a:        (in_features, rank)
    compute_dtype: optional dtype (e.g. jnp.bfloat16) for the matmul; the cast
                   happens inside the kernel (HBM stream keeps x's dtype),
                   accumulation/SiLU stay f32, output keeps x.dtype.
    returns:       (..., rank)
    """
    in_features, rank = cola_a.shape
    assert x.shape[-1] == in_features
    lead_shape = x.shape[:-1]
    m = math.prod(lead_shape) if lead_shape else 1
    out_dtype = x.dtype

    x2d = x.reshape(m, in_features)

    cd = None
    if compute_dtype is not None and jnp.dtype(compute_dtype) != x2d.dtype:
        cd = jnp.dtype(compute_dtype)

    x_bytes = x2d.dtype.itemsize
    a_bytes = cola_a.dtype.itemsize
    out_bytes = jnp.dtype(out_dtype).itemsize

    budget, limit_cap, two_cores = _tpu_vmem_info()
    tm_eff, tk_eff, resident_a, fp = _plan(
        m, in_features, rank, x_bytes, a_bytes, out_bytes,
        tm, tk, budget, two_cores, a_resident)

    grid_m = pl.cdiv(m, tm_eff)
    vmem_limit = int(min(max(fp + (8 << 20), 32 << 20), limit_cap))

    cost = pl.CostEstimate(
        flops=2 * m * in_features * rank,
        transcendentals=m * rank,
        bytes_accessed=(m * in_features * x_bytes
                        + in_features * rank * a_bytes
                        + m * rank * out_bytes),
    )

    if tk_eff >= in_features:
        # ---- common case: full-K row tiles, no scratch / accumulator -------
        out2d = pl.pallas_call(
            functools.partial(_fullk_kernel, compute_dtype=cd),
            out_shape=jax.ShapeDtypeStruct((m, rank), out_dtype),
            grid_spec=pltpu.PrefetchScalarGridSpec(
                num_scalar_prefetch=0,
                grid=(grid_m,),
                in_specs=[
                    pl.BlockSpec((tm_eff, in_features), lambda i: (i, 0)),
                    # Constant block index => cola_a DMA'd once, stays resident.
                    pl.BlockSpec((in_features, rank), lambda i: (0, 0)),
                ],
                out_specs=pl.BlockSpec((tm_eff, rank), lambda i: (i, 0)),
            ),
            compiler_params=pltpu.CompilerParams(
                dimension_semantics=("parallel",),
                vmem_limit_bytes=vmem_limit,
            ),
            cost_estimate=cost,
        )(x2d, cola_a)
    else:
        grid_k = in_features // tk_eff
        if resident_a:
            # cola_a kept whole in VMEM, block index never changes (no re-DMA
            # per row tile); the K chunk is sliced inside the kernel.
            a_spec = pl.BlockSpec((in_features, rank), lambda i, kk: (0, 0))
        else:
            # Fallback for huge K*rank: stream a (tk, rank) slice per step.
            a_spec = pl.BlockSpec((tk_eff, rank), lambda i, kk: (kk, 0))
        out2d = pl.pallas_call(
            functools.partial(_ktiled_kernel, tk=tk_eff,
                              resident_a=resident_a, compute_dtype=cd),
            out_shape=jax.ShapeDtypeStruct((m, rank), out_dtype),
            grid_spec=pltpu.PrefetchScalarGridSpec(
                num_scalar_prefetch=0,
                grid=(grid_m, grid_k),
                in_specs=[
                    pl.BlockSpec((tm_eff, tk_eff), lambda i, kk: (i, kk)),
                    a_spec,
                ],
                out_specs=pl.BlockSpec((tm_eff, rank), lambda i, kk: (i, 0)),
                scratch_shapes=[pltpu.VMEM((tm_eff, rank), jnp.float32)],
            ),
            compiler_params=pltpu.CompilerParams(
                dimension_semantics=("parallel", "arbitrary"),
                vmem_limit_bytes=vmem_limit,
            ),
            cost_estimate=cost,
        )(x2d, cola_a)

    return out2d.reshape(*lead_shape, rank)


# --------------------------------------------------------------------------- #
# Reference / init helpers + tests
# --------------------------------------------------------------------------- #
def init_cola_a(key, in_features, out_features, rank, dtype=jnp.float32):
    # Matches: torch.randn(in_features, rank) / rank**(1/4) * target_sdv**(1/2)
    target_sdv = (in_features + out_features) ** (-1.0 / 2.0)
    w = jax.random.normal(key, (in_features, rank), dtype=dtype)
    return w / (rank ** 0.25) * (target_sdv ** 0.5)


def _silu_ref(x, a):
    out = x @ a
    return out * jax.nn.sigmoid(out)


if __name__ == "__main__":
    key = jax.random.PRNGKey(0)
    k1, k2, k3, k4 = jax.random.split(key, 4)

    # --- test 1: small shapes consistent with the module spec ---------------
    batch, seq = 2, 8
    in_features, out_features, rank = 32, 64, 16
    x = jax.random.normal(k1, (batch, seq, in_features), dtype=jnp.float32)
    cola_a = init_cola_a(k2, in_features, out_features, rank)

    out = jax.block_until_ready(cola_m_down_proj(x, cola_a))
    ref = _silu_ref(x, cola_a)
    assert out.shape == (batch, seq, rank)
    assert jnp.allclose(out, ref, atol=1e-5, rtol=1e-5)

    # --- test 2: lane-aligned K/rank, ragged M (full-K fast path) -----------
    batch2, seq2 = 3, 100                     # M = 300
    in2, outf2, rank2 = 256, 512, 128
    x2 = jax.random.normal(k3, (batch2, seq2, in2), dtype=jnp.float32)
    a2 = init_cola_a(k4, in2, outf2, rank2)

    y2 = jax.block_until_ready(cola_m_down_proj(x2, a2))
    ref2 = _silu_ref(x2, a2)
    assert y2.shape == (batch2, seq2, rank2)
    assert jnp.allclose(y2, ref2, atol=3e-2, rtol=3e-2)

    # --- test 3: bf16 compute path (cast inside kernel; f32 accum + SiLU) ---
    y3 = jax.block_until_ready(
        cola_m_down_proj(x2, a2, compute_dtype=jnp.bfloat16)
    )
    ref3 = _silu_ref(
        x2.astype(jnp.bfloat16).astype(jnp.float32),
        a2.astype(jnp.bfloat16).astype(jnp.float32),
    )
    assert y3.dtype == x2.dtype
    assert jnp.allclose(y3, ref3, atol=3e-2, rtol=3e-2)

    # --- test 4: forced K-tiling, cola_a resident (accumulator path) --------
    y4 = jax.block_until_ready(cola_m_down_proj(x2, a2, tk=128))
    assert jnp.allclose(y4, ref2, atol=3e-2, rtol=3e-2)

    # --- test 5: forced K-tiling with streamed cola_a (huge-K*R fallback) ---
    y5 = jax.block_until_ready(
        cola_m_down_proj(x2, a2, tk=128, a_resident=False)
    )
    assert jnp.allclose(y5, ref2, atol=3e-2, rtol=3e-2)

    print("KERNEL_OK")
</pallas_src>

<mosaic_0001>
module attributes {stable_mosaic.version = 11 : i64} {
  func.func @_fullk_kernel(%arg0: i32, %arg1: memref<8x32xf32, #tpu.memory_space<vmem>>, %arg2: memref<32x16xf32, #tpu.memory_space<vmem>>, %arg3: memref<8x16xf32, #tpu.memory_space<vmem>>) attributes {dimension_semantics = [#tpu.dimension_semantics<parallel>], iteration_bounds = array<i64: 2>, scalar_prefetch = 0 : i64, scratch_operands = 0 : i64, tpu.core_type = #tpu.core_type<tc>, window_params = [{transform_indices = @transform_0, window_bounds = array<i64: 8, 32>}, {pipeline_mode = #tpu.pipeline_mode<synchronous>, transform_indices = @transform_1, window_bounds = array<i64: 32, 16>}, {transform_indices = @transform_2, window_bounds = array<i64: 8, 16>}]} {
    %c0 = arith.constant 0 : index
    %c0_0 = arith.constant 0 : index
    %0 = vector.load %arg1[%c0, %c0_0] : memref<8x32xf32, #tpu.memory_space<vmem>>, vector<8x32xf32>
    %c0_1 = arith.constant 0 : index
    %c0_2 = arith.constant 0 : index
    %1 = vector.load %arg2[%c0_1, %c0_2] : memref<32x16xf32, #tpu.memory_space<vmem>>, vector<32x16xf32>
    %cst = arith.constant dense<0.000000e+00> : vector<8x16xf32>
    %2 = tpu.matmul %0, %1, %cst {dimension_numbers = #tpu.dot_dimension_numbers<[1], [0], [0], [1], [0, 0, 1, 1], [], []>} : vector<8x32xf32>, vector<32x16xf32>, vector<8x16xf32> -> vector<8x16xf32>
    %3 = arith.negf %2 : vector<8x16xf32>
    %4 = math.exp %3 : vector<8x16xf32>
    %cst_3 = arith.constant 1.000000e+00 : f32
    %5 = vector.broadcast %cst_3 : f32 to vector<8x16xf32>
    %6 = arith.addf %5, %4 : vector<8x16xf32>
    %7 = arith.divf %5, %6 : vector<8x16xf32>
    %8 = arith.mulf %2, %7 : vector<8x16xf32>
    %c0_4 = arith.constant 0 : index
    %c0_5 = arith.constant 0 : index
    %9 = vector.load %arg3[%c0_4, %c0_5] : memref<8x16xf32, #tpu.memory_space<vmem>>, vector<8x16xf32>
    tpu.vector_store %arg3[%c0_4, %c0_5], %8 {strides = array<i32>} : memref<8x16xf32, #tpu.memory_space<vmem>>, vector<8x16xf32>,
    return
  }
  func.func @transform_0(%arg0: i32) -> (i32, i32) {
    %c0_i32 = arith.constant 0 : i32
    %c0_i32_0 = arith.constant 0 : i32
    return %arg0, %c0_i32 : i32, i32
  }
  func.func @transform_1(%arg0: i32) -> (i32, i32) {
    %c0_i32 = arith.constant 0 : i32
    %c0_i32_0 = arith.constant 0 : i32
    %c0_i32_1 = arith.constant 0 : i32
    return %c0_i32, %c0_i32_0 : i32, i32
  }
  func.func @transform_2(%arg0: i32) -> (i32, i32) {
    %c0_i32 = arith.constant 0 : i32
    %c0_i32_0 = arith.constant 0 : i32
    return %arg0, %c0_i32 : i32, i32
  }
}

</mosaic_0001>

<bundles_post_ra>
// kernel: cola_m_down_proj.1
= control target key start
LH: loop header
LB: loop body
LE: loop exit
PB: predicated region body
PF: predicated region fallthrough
CT: control target
= control target key end

     0   :  { %7 = vsyncpa [#allocation3], 0  ;;  %s575_s0 = inlined_call_operand.vmem [shape: f32[16,32], index: 0, kind: input, shape index: {}]   ;;  %s576_s1 = inlined_call_operand.vmem [shape: f32[32,16], index: 1, kind: input, shape index: {}]   ;;  %s577_s2 = inlined_call_operand.hbm [shape: f32[16,16], index: 2, kind: output, shape index: {}]  }
   0x1   :  { %9 = vsyncpa [#allocation3 + $0x1], 0  ;;  %s463_s9 = smov 0   ;;  %s465_s10 = smov 0  }
   0x2   :  { %s467_s11 = smov 0   ;;  %s469_s12 = smov 0  }
   0x3 LB: > { %s484_s13 = sadd.s32 4294967295, %s442_s12   ;;  %s300_s14 = sadd.s32 4294967294, %s442_s12   ;;  %s442_s12 = sphi %s469_s12, %s583_s12   ;;  %s438_s11 = sphi %s467_s11, %s582_s11   ;;  %s434_s10 = sphi %s465_s10, %s581_s10   ;;  %s430_s9 = sphi %s463_s9, %s580_s9  }
   0x4   : > { %s488_s15 = sadd.s32 1, %s442_s12   ;;  %s69_s16 = sadd.s32 1, %s438_s11 }
   0x5   : > { %s66_s17 = ssub.s32 %s442_s12, %s488_s15  ;;  %p79_p0 = scmp.ne.s32.totalorder %s438_s11, %s434_s10 }
   0x6   : > { %p67_p1 = scmp.eq.s32.totalorder %s66_s17, 0  ;;  %p80_p2 = scmp.eq.s32.totalorder %s484_s13, 1 }
   0x7   : > { %p85_p3 = scmp.ne.s32.totalorder %s434_s10, %s430_s9  ;;  %p86_p4 = scmp.eq.s32.totalorder %s300_s14, 1 }
   0x8   : > { %s499_s18 = scalar_select %p67_p1, %s438_s11, %s69_s16  }
   0x9   : > { %p501_p5 = por %p80_p2, %p79_p0  ;;  %p505_p6 = por %p86_p4, %p85_p3 }
   0xa   : > { %p303_p7 = scmp.ge.s32.totalorder %s442_s12, 1  ;;  %p114_p8 = scmp.lt.s32.totalorder %s442_s12, 3 }
   0xc   : > { %p115_p9 = pnand %p303_p7, %p114_p8 }
   0xd   : > { %v140_v0 = vld [vmem:[%s576_s1] sm:$0xff] (!%p115_p9)  ;;  %v141_v1 = vld [vmem:[%s576_s1 + $0x8] sm:$0xff] (!%p115_p9)  ;;  %v142_v2 = vld [vmem:[%s576_s1 + $0x10] sm:$0xff] (!%p115_p9)  ;;  %v444_v3 = vmov (!%p115_p9), 0.0|0.0   ;;  %vm445_vm0 = vmmov (!%p115_p9), 0   ;;  %v446_v6 = vmov (!%p115_p9), 0.0  }
   0xe   : > { %118 = sbr.rel (%p115_p9) target bundleno = 280 (0x118), region = 28  ;;  %328 = vmatprep.subr.bf16.mxu0 (!%p115_p9), %v444_v3  ;;  %v329_v4 = vpack.c.bf16 (!%p115_p9), %v141_v1, %v140_v0  ;;  %v143_v5 = vld [vmem:[%s576_s1 + $0x18] sm:$0xff] (!%p115_p9)  ;;  %325 = vmatprep.mubr.msk.f32.mxu0 (!%p115_p9), %vm445_vm0, %v446_v6  ;;  %p135_p10 = scmp.lt.s32.totalorder (!%p115_p9), %s484_s13, 1  ;;  %vm144_vm1 = vcmask (!%p115_p9), 261120   ;;  %vm225_vm2 = vcmask (!%p115_p9), 130048  }
   0xf   : > { %v332_v7 = vpack.c.bf16 (!%p115_p9), %v143_v5, %v142_v2  ;;  %s132_s6 = sand.u32 (!%p115_p9), 1, %s434_s10   ;;  %s309_s8 = sshll.u32 (!%p115_p9), %s484_s13, 7 }
  0x10   : > { %330 = vmatpush3.bf16.msra.mxu0 (!%p115_p9), %v329_v4  ;;  %s304_s7 = sshll.u32 (!%p115_p9), %s132_s6, 3  ;;  %s533_s22 = scalar_lea.hbm (!%p115_p9), %s577_s2, %s309_s8 }
  0x11   : > { %331 = vmatprep.subr.bf16.mxu0 (!%p115_p9), %v444_v3  ;;  %s134_s14 = scalar_lea.vmem (!%p115_p9), [#allocation2], %s304_s7  ;;  %s228_s23 = scalar_lea.sflag (!%p115_p9), [#allocation3], %s132_s6 }
  0x12   : > { %s241_s16 = sshll.u32 (!%p115_p9), %s134_s14, 4  ;;  %s535_s16 = int_to_ptr.vmem [resolvable:$true] %s241_s16 }
  0x13   : > { %s380_s24 = scalar_lea.vmem (!%p115_p9), %s535_s16, 128 }
  0x14   : > { %333 = vmatpush3.bf16.msra.mxu0 (!%p115_p9), %v332_v7  ;;  %p381_p11 = scmp.ne.s32.totalorder (!%p115_p9), %s535_s16, %s380_s24 }
  0x15   : > { %s136_s29 = scalar_select %p135_p10, %s484_s13, 1 }
  0x16   : > { %p382_p12 = pnand %p381_p11, %p501_p5  ;;  %s447_s13 = smov [#allocation2]  }
  0x17   : > { %s305_s30 = sshll.u32 %s136_s29, 3  ;;  %s384_s25 = sshll.u32 %s447_s13, 4  ;;  %s385_s25 = int_to_ptr.vmem [resolvable:$false] %s384_s25 }
  0x18   : > { %s138_s5 = scalar_lea.vmem %s575_s0, %s305_s30  ;;  %p383_p13 = pneg %p382_p12 }
  0x19   : > { %v139_v8 = vld [vmem:[%s138_s5] sm:$0xff]  ;;  %s386_s26 = scalar_lea.vmem %s385_s25, 256  ;;  %p387_p0 = scmp.lt.s32.totalorder %s535_s16, %s385_s25 }
  0x1a   : > { %326 = vmatmul.mubr.msk.f32.vlgmr.msra.gmra.mrb[0].mxu0 %vm144_vm1, %v139_v8  ;;  %p388_p1 = scmp.lt.s32.totalorder %s386_s26, %s380_s24 }
  0x1c   : > { %p389_p2 = por %p388_p1, %p387_p0 }
  0x1e   : > { %p390_p3 = pnand %p389_p2, %p383_p13 }
  0xed   : > { %v214_v9 = vpop.f32.mrb[0].mxu0 }
  0xee   : > { %v307_v10 = vmul.f32 -1.442695, %v214_v9  ;;  %v327_v11 = vpop.f32.mrb[1].mxu0 }
  0xf0   : > { %376 = vpow2.f32 %v307_v10 }
  0xfa   : > { %v377_v12 = vpop.eup %376 }
  0xfb   : > { %v221_v13 = vadd.f32 1.0, %v377_v12 }
  0xfd   : > { %378 = vrcp.f32 %v221_v13 }
 0x107   : > { %v379_v14 = vpop.eup %378 }
 0x108   : > { %v224_v15 = vmul.f32 %v379_v14, %v214_v9 }
 0x10a   : > { %226 = vst.msk [vmem:[%s134_s14] sm:$0xff] %vm225_vm2, %v224_v15 }
 0x10b   : > { %393 = shalt.err (!%p390_p3)
}
 0x10c   : > { %s394_s27 = scalar_lea.hbm %s533_s22, 128  ;;  %s398_s30 = scalar_lea.hbm %s577_s2, 256 }
 0x10d   : > { %p395_p4 = scmp.ne.s32.totalorder %s533_s22, %s394_s27  ;;  %p399_p9 = scmp.lt.u32.totalorder %s533_s22, %s577_s2 }
 0x10e   : > { %p400_p10 = scmp.lt.u32.totalorder %s398_s30, %s394_s27  ;;  %p402_p12 = scmp.lt.u32.totalorder %s394_s27, %s533_s22 }
 0x10f   : > { %p396_p7 = pnand %p395_p4, %p501_p5 }
 0x110   : > { %p401_p11 = por %p400_p10, %p399_p9 }
 0x111   : > { %p397_p8 = pneg %p396_p7 }
 0x112   : > { %p403_p13 = por %p402_p12, %p401_p11 }
 0x114   : > { %p404_p0 = pnand %p403_p13, %p397_p8 }
 0x116   : > { %407 = shalt.err (!%p404_p0)
}
 0x117   : > { %334 = dma.vmem_to_hbm [thread:$0]  (%p501_p5), %s535_s16, 128, %s533_s22, %s228_s23  }
 0x118 PF: > { %p340_p1 = scmp.ge.s32.totalorder %s442_s12, 2  ;;  %s253_s5 = sand.u32 1, %s430_s9  }
 0x119   : > { %s254_s6 = scalar_lea.sflag [#allocation3], %s253_s5 }
 0x11a   : > { %p337_p2 = pnand %p340_p1, %p505_p6 }
 0x11c   : > { %425 = dma.done.wait (!%p337_p2), %s254_s6, 128  }
 0x11d   : > { %427 = vsyncadd (!%p337_p2), %s254_s6, 4294967168  ;;  %p12_p3 = scmp.ge.s32.totalorder %s488_s15, 4   ;;  %s580_s9 = smov %s434_s10 }
 0x11e   : > { %s581_s10 = smov %s438_s11  ;;  %s582_s11 = smov %s499_s18 }
 0x11f   : > { %s583_s12 = smov %s488_s15  ;;  %14 = sbr.rel (!%p12_p3) target bundleno = 3 (0x3), region = 63 }
 0x126   :  { %259 = vsyncpa [#allocation3], 1 }
 0x127   :  { %261 = vsyncpa [#allocation3 + $0x1], 1 }

</bundles_post_ra>
